<compile_context>
chip_gen: v6e
topology: v6e:2x2x1
jax: 0.10.0
libtpu: 0.0.40
codegen_flags: <defaults>
</compile_context>

<pallas_src>
import functools

import jax
import jax.numpy as jnp
from jax.experimental import pallas as pl
from jax.experimental.pallas import tpu as pltpu


def _round_up(a, m):
    return ((a + m - 1) // m) * m


def _mm_bias_kernel(x_ref, w_ref, b_ref, o_ref, *, apply_relu):
    """One node tile: out = x @ W + b, f32 accumulation, optional fused ReLU."""
    acc = jnp.dot(x_ref[...], w_ref[...], preferred_element_type=jnp.float32)
    acc = acc + b_ref[...]
    if apply_relu:
        acc = jnp.maximum(acc, 0.0)
    o_ref[...] = acc.astype(o_ref.dtype)


def fused_matmul_bias(x, w, b, *, apply_relu=False, tm=128):
    """out = x @ w + b (optionally ReLU'd), one K-deep MXU pass per node tile.

    - operands cast to bf16 (MXU inputs), accumulate in f32 (bias/ReLU in f32).
    - Cout padded to a multiple of 128 for lane-dense stores, sliced afterwards.
    - node axis tiled; for small N the whole axis is a single block (grid = 1).
      Weights/bias have constant block index so they stay VMEM-resident.
    """
    N, K = x.shape
    Kw, Cout = w.shape
    assert K == Kw, "x / w contraction dims must match"

    cout_pad = _round_up(Cout, 128)
    # Node padding: 16-row alignment for bf16 sublane packing.
    if N <= tm:
        n_pad = _round_up(N, 16)
        tm_eff = n_pad
    else:
        tm_eff = tm
        n_pad = _round_up(N, tm_eff)

    xp = x if n_pad == N else jnp.pad(x, ((0, n_pad - N), (0, 0)))
    wp = w if cout_pad == Cout else jnp.pad(w, ((0, 0), (0, cout_pad - Cout)))
    bp = b if cout_pad == Cout else jnp.pad(b, (0, cout_pad - Cout))

    x_bf = xp.astype(jnp.bfloat16)
    w_bf = wp.astype(jnp.bfloat16)
    b2 = bp.reshape(1, cout_pad).astype(jnp.float32)

    kernel = functools.partial(_mm_bias_kernel, apply_relu=apply_relu)
    out = pl.pallas_call(
        kernel,
        out_shape=jax.ShapeDtypeStruct((n_pad, cout_pad), jnp.float32),
        grid_spec=pltpu.PrefetchScalarGridSpec(
            num_scalar_prefetch=0,
            grid=(n_pad // tm_eff,),
            in_specs=[
                pl.BlockSpec((tm_eff, K), lambda i: (i, 0)),       # node tile
                pl.BlockSpec((K, cout_pad), lambda i: (0, 0)),     # fused weights (resident)
                pl.BlockSpec((1, cout_pad), lambda i: (0, 0)),     # bias (resident)
            ],
            out_specs=pl.BlockSpec((tm_eff, cout_pad), lambda i: (i, 0)),
        ),
        compiler_params=pltpu.CompilerParams(
            dimension_semantics=("parallel",)),
    )(x_bf, w_bf, b2)
    return out[:N, :Cout]


def relation_mean_agg(x, edge_index, edge_type, num_relations):
    """Mean of source-node features per (relation, destination node).

    Plain-JAX glue: data-dependent gather/scatter (segment_sum). Empty
    (relation, node) neighborhoods contribute zero, matching RGCNConv mean."""
    N, C = x.shape
    src = edge_index[0]
    dst = edge_index[1]
    msgs = x[src]                                   # (E, C) gather
    seg = edge_type * N + dst                       # (E,)
    sums = jax.ops.segment_sum(msgs, seg, num_segments=num_relations * N)
    cnts = jax.ops.segment_sum(jnp.ones((src.shape[0], 1), x.dtype), seg,
                               num_segments=num_relations * N)
    agg = sums / jnp.maximum(cnts, 1.0)
    return agg.reshape(num_relations, N, C)


def init_rgcn_params(key, in_c, out_c, num_rel):
    k1, k2 = jax.random.split(key)
    scale = 1.0 / jnp.sqrt(jnp.float32(in_c))
    w = jax.random.uniform(k1, (num_rel, in_c, out_c), jnp.float32,
                           -scale, scale)
    w_root = jax.random.uniform(k2, (in_c, out_c), jnp.float32,
                                -scale, scale)
    b = jnp.zeros((out_c,), jnp.float32)
    return w, w_root, b


def net_forward(params, x, edge_index, edge_type, edge_ptr):
    # TODO(synk): edge_ptr (CSR offsets of the type-sorted edge list) is
    # redundant with edge_type for this formulation and is accepted but unused.
    (w1, wr1, b1), (w2, wr2, b2) = params
    num_rel, c_in, c_hid = w1.shape
    c_out = w2.shape[-1]
    N = x.shape[0]
    src = edge_index[0]
    dst = edge_index[1]

    # ---------- layer 1: transform-then-aggregate (exact: mean is linear).
    # One fused matmul: x @ [W_root | W_0 | ... | W_{R-1}]  (K=128, Nout=(R+1)*16)
    # with the bias baked into the root block only.
    w1_cat = jnp.concatenate(
        [wr1[:, None, :], jnp.transpose(w1, (1, 0, 2))], axis=1
    ).reshape(c_in, (num_rel + 1) * c_hid)
    b1_cat = jnp.concatenate([b1, jnp.zeros((num_rel * c_hid,), b1.dtype)])
    t = fused_matmul_bias(x, w1_cat, b1_cat, apply_relu=False)
    t_root = t[:, :c_hid]                                   # x @ W_root + b
    t_rel = t[:, c_hid:].reshape(N, num_rel, c_hid)         # x @ W_r, all r

    # 16-wide gather + per-(relation, dst) mean of the *transformed* messages.
    msgs = t_rel[src, edge_type]                            # (E, c_hid)
    seg = edge_type * N + dst
    sums = jax.ops.segment_sum(msgs, seg, num_segments=num_rel * N)
    cnts = jax.ops.segment_sum(jnp.ones((src.shape[0], 1), x.dtype), seg,
                               num_segments=num_rel * N)
    means = sums / jnp.maximum(cnts, 1.0)
    h = jnp.maximum(t_root + means.reshape(num_rel, N, c_hid).sum(axis=0), 0.0)

    # ---------- layer 2: aggregate-then-transform with the relation axis folded
    # into the matmul K dimension -> ONE (N, (R+1)*16) @ ((R+1)*16, Cout) dot.
    agg2 = relation_mean_agg(h, edge_index, edge_type, num_rel)   # (R, N, c_hid)
    x2 = jnp.concatenate(
        [h, jnp.transpose(agg2, (1, 0, 2)).reshape(N, num_rel * c_hid)], axis=1)
    w2_cat = jnp.concatenate([wr2, w2.reshape(num_rel * c_hid, c_out)], axis=0)
    out = fused_matmul_bias(x2, w2_cat, b2, apply_relu=False)     # (N, 349)
    return out


if __name__ == "__main__":
    NUM_NODES = 64          # small synthetic graph
    NUM_EDGES = 256
    NUM_REL = 8             # from RGCNConv(..., 8)
    C_IN = 128              # RGCNConv(128, 16, 8)
    C_HID = 16
    C_OUT = 349             # RGCNConv(16, 349, 8)

    key = jax.random.PRNGKey(0)
    kx, ke, kt, kp1, kp2 = jax.random.split(key, 5)

    x = jax.random.normal(kx, (NUM_NODES, C_IN), jnp.float32)
    edge_index = jax.random.randint(ke, (2, NUM_EDGES), 0, NUM_NODES,
                                    dtype=jnp.int32)
    edge_type = jnp.sort(jax.random.randint(kt, (NUM_EDGES,), 0, NUM_REL,
                                            dtype=jnp.int32))
    edge_ptr = jnp.searchsorted(edge_type,
                                jnp.arange(NUM_REL + 1, dtype=jnp.int32))

    params = (
        init_rgcn_params(kp1, C_IN, C_HID, NUM_REL),
        init_rgcn_params(kp2, C_HID, C_OUT, NUM_REL),
    )

    out = net_forward(params, x, edge_index, edge_type, edge_ptr)
    out = jax.block_until_ready(out)
    assert out.shape == (NUM_NODES, C_OUT)
    print("KERNEL_OK")
</pallas_src>

<mosaic_0001>
module attributes {stable_mosaic.version = 11 : i64} {
  func.func @_mm_bias_kernel(%arg0: i32, %arg1: memref<64x128xbf16, #tpu.memory_space<vmem>>, %arg2: memref<128x256xbf16, #tpu.memory_space<vmem>>, %arg3: memref<1x256xf32, #tpu.memory_space<vmem>>, %arg4: memref<64x256xf32, #tpu.memory_space<vmem>>) attributes {dimension_semantics = [#tpu.dimension_semantics<parallel>], iteration_bounds = array<i64: 1>, scalar_prefetch = 0 : i64, scratch_operands = 0 : i64, tpu.core_type = #tpu.core_type<tc>, window_params = [{transform_indices = @transform_0, window_bounds = array<i64: 64, 128>}, {pipeline_mode = #tpu.pipeline_mode<synchronous>, transform_indices = @transform_1, window_bounds = array<i64: 128, 256>}, {pipeline_mode = #tpu.pipeline_mode<synchronous>, transform_indices = @transform_2, window_bounds = array<i64: 1, 256>}, {transform_indices = @transform_3, window_bounds = array<i64: 64, 256>}]} {
    %c0 = arith.constant 0 : index
    %c0_0 = arith.constant 0 : index
    %0 = vector.load %arg1[%c0, %c0_0] : memref<64x128xbf16, #tpu.memory_space<vmem>>, vector<64x128xbf16>
    %c0_1 = arith.constant 0 : index
    %c0_2 = arith.constant 0 : index
    %1 = vector.load %arg2[%c0_1, %c0_2] : memref<128x256xbf16, #tpu.memory_space<vmem>>, vector<128x256xbf16>
    %cst = arith.constant dense<0.000000e+00> : vector<64x256xf32>
    %2 = tpu.matmul %0, %1, %cst {dimension_numbers = #tpu.dot_dimension_numbers<[1], [0], [0], [1], [0, 0, 1, 1], [], []>} : vector<64x128xbf16>, vector<128x256xbf16>, vector<64x256xf32> -> vector<64x256xf32>
    %c0_3 = arith.constant 0 : index
    %c0_4 = arith.constant 0 : index
    %3 = vector.load %arg3[%c0_3, %c0_4] : memref<1x256xf32, #tpu.memory_space<vmem>>, vector<1x256xf32>
    %4 = vector.broadcast %3 : vector<1x256xf32> to vector<64x256xf32>
    %5 = arith.addf %2, %4 : vector<64x256xf32>
    %c0_5 = arith.constant 0 : index
    %c0_6 = arith.constant 0 : index
    %6 = vector.load %arg4[%c0_5, %c0_6] : memref<64x256xf32, #tpu.memory_space<vmem>>, vector<64x256xf32>
    tpu.vector_store %arg4[%c0_5, %c0_6], %5 {strides = array<i32>} : memref<64x256xf32, #tpu.memory_space<vmem>>, vector<64x256xf32>,
    return
  }
  func.func @transform_0(%arg0: i32) -> (i32, i32) {
    %c0_i32 = arith.constant 0 : i32
    %c0_i32_0 = arith.constant 0 : i32
    return %arg0, %c0_i32 : i32, i32
  }
  func.func @transform_1(%arg0: i32) -> (i32, i32) {
    %c0_i32 = arith.constant 0 : i32
    %c0_i32_0 = arith.constant 0 : i32
    %c0_i32_1 = arith.constant 0 : i32
    return %c0_i32, %c0_i32_0 : i32, i32
  }
  func.func @transform_2(%arg0: i32) -> (i32, i32) {
    %c0_i32 = arith.constant 0 : i32
    %c0_i32_0 = arith.constant 0 : i32
    %c0_i32_1 = arith.constant 0 : i32
    return %c0_i32, %c0_i32_0 : i32, i32
  }
  func.func @transform_3(%arg0: i32) -> (i32, i32) {
    %c0_i32 = arith.constant 0 : i32
    %c0_i32_0 = arith.constant 0 : i32
    return %arg0, %c0_i32 : i32, i32
  }
}

</mosaic_0001>

<bundles_post_ra>
// kernel: tpu_custom_call.1
= control target key start
LH: loop header
LB: loop body
LE: loop exit
PB: predicated region body
PF: predicated region fallthrough
CT: control target
= control target key end

     0   :  { %8 = vsyncpa [#allocation3], 0  ;;  %s473_s0 = inlined_call_operand.hbm [shape: bf16[64,128], index: 0, kind: input, shape index: {}]   ;;  %s474_s1 = inlined_call_operand.hbm [shape: bf16[128,256], index: 1, kind: input, shape index: {}]   ;;  %s475_s2 = inlined_call_operand.vmem [shape: f32[1,256], index: 2, kind: input, shape index: {}]   ;;  %s476_s3 = inlined_call_operand.hbm [shape: f32[64,256], index: 3, kind: output, shape index: {}]  }
   0x1   :  { %9 = vsyncpa [#allocation6], 0 }
   0x2   :  { %10 = vsyncpa [#allocation4], 0  ;;  %s431_s12 = smov [#allocation2]  }
   0x3   :  { %s16_s13 = sshll.u32 %s431_s12, 4  ;;  %s17_s13 = int_to_ptr.vmem [resolvable:$true] %s16_s13 }
   0x4   :  { %s373_s14 = scalar_lea.vmem %s17_s13, 512  ;;  %p378_p1 = scmp.lt.s32.totalorder %s17_s13, %s17_s13 }
   0x5   :  { %p374_p0 = scmp.ne.s32.totalorder %s17_s13, %s373_s14  ;;  %p379_p2 = scmp.lt.s32.totalorder %s373_s14, %s373_s14 }
   0x7   :  { %p380_p3 = por %p379_p2, %p378_p1 }
   0x9   :  { %p381_p4 = pnand %p380_p3, %p374_p0 }
   0xb   :  { %384 = shalt.err (!%p381_p4)
}
   0xc   :  { %s432_s15 = smov 64   ;;  %s433_s16 = smov 4  }
   0xd   :  { %22 = dma.hbm_to_vmem [thread:$0]  %s473_s0, 512, %s17_s13, [#allocation3], %s432_s15, %s432_s15, %s433_s16  }
   0xe   :  { %s434_s19 = smov [#allocation5]  }
   0xf   :  { %s28_s20 = sshll.u32 %s434_s19, 4  ;;  %s29_s20 = int_to_ptr.vmem [resolvable:$true] %s28_s20 }
  0x10   :  { %s393_s21 = scalar_lea.vmem %s29_s20, 2048  ;;  %p398_p6 = scmp.lt.s32.totalorder %s29_s20, %s29_s20 }
  0x11   :  { %p394_p5 = scmp.ne.s32.totalorder %s29_s20, %s393_s21  ;;  %p399_p7 = scmp.lt.s32.totalorder %s393_s21, %s393_s21 }
  0x13   :  { %p400_p8 = por %p399_p7, %p398_p6 }
  0x15   :  { %p401_p9 = pnand %p400_p8, %p394_p5 }
  0x17   :  { %404 = shalt.err (!%p401_p9)
}
  0x18   :  { %s435_s22 = smov 128   ;;  %s436_s23 = smov 8  }
  0x19   :  { %34 = dma.hbm_to_vmem [thread:$0]  %s474_s1, 2048, %s29_s20, [#allocation6], %s435_s22, %s435_s22, %s436_s23  }
  0x1a   :  { %425 = dma.done.wait [#allocation3], 512  }
  0x1b   :  { %426 = vsyncadd [#allocation3], 4294966784 }
  0x1c   :  { %427 = dma.done.wait [#allocation6], 2048  }
  0x1d   :  { %428 = vsyncadd [#allocation6], 4294965248  ;;  %v437_v0 = vmov 0   ;;  %v337_v1 = vld [vmem:[#allocation5 + $0x74] ss:$8 sps:$4 sm:$0xff]   ;;  %v361_v17 = vld [vmem:[#allocation2] sm:$0xff]   ;;  %v70_v21 = vlaneseq }
  0x1e   :  { %216 = vmatprep.mubr.bf16.mxu0 %v437_v0  ;;  %236 = vmatprep.mubr.bf16.mxu1 %v437_v0  ;;  %v339_v2 = vld [vmem:[#allocation5 + $0x70] ss:$8 sps:$4 sm:$0xff]   ;;  %v340_v3 = vld [vmem:[#allocation5 + $0x64] ss:$8 sps:$4 sm:$0xff]   ;;  %v342_v4 = vld [vmem:[#allocation5 + $0x60] ss:$8 sps:$4 sm:$0xff]  }
  0x1f   :  { %184 = vmatprep.subr.bf16.mxu0 %v337_v1  ;;  %311 = vmatprep.subr.bf16.mxu1 %v337_v1  ;;  %v343_v5 = vld [vmem:[#allocation5 + $0x54] ss:$8 sps:$4 sm:$0xff]   ;;  %v345_v6 = vld [vmem:[#allocation5 + $0x50] ss:$8 sps:$4 sm:$0xff]   ;;  %v346_v7 = vld [vmem:[#allocation5 + $0x44] ss:$8 sps:$4 sm:$0xff]  }
  0x20   :  { %185 = vmatpush1.bf16.msra.mxu0 %v339_v2  ;;  %319 = vmatpush1.bf16.msra.mxu1 %v339_v2  ;;  %v348_v8 = vld [vmem:[#allocation5 + $0x40] ss:$8 sps:$4 sm:$0xff]   ;;  %v349_v9 = vld [vmem:[#allocation5 + $0x34] ss:$8 sps:$4 sm:$0xff]   ;;  %v351_v10 = vld [vmem:[#allocation5 + $0x30] ss:$8 sps:$4 sm:$0xff]  }
  0x21   :  { %186 = vmatprep.subr.bf16.mxu0 %v340_v3  ;;  %312 = vmatprep.subr.bf16.mxu1 %v340_v3  ;;  %v352_v11 = vld [vmem:[#allocation5 + $0x24] ss:$8 sps:$4 sm:$0xff]   ;;  %v354_v12 = vld [vmem:[#allocation5 + $0x20] ss:$8 sps:$4 sm:$0xff]   ;;  %v355_v13 = vld [vmem:[#allocation5 + $0x14] ss:$8 sps:$4 sm:$0xff]  }
  0x22   :  { %v357_v14 = vld [vmem:[#allocation5 + $0x10] ss:$8 sps:$4 sm:$0xff]   ;;  %v358_v15 = vld [vmem:[#allocation5 + $0x4] ss:$8 sps:$4 sm:$0xff]   ;;  %v360_v16 = vld [vmem:[#allocation5] ss:$8 sps:$4 sm:$0xff]  }
  0x23   :  { %v362_v18 = vld [vmem:[#allocation2 + $0x10] sm:$0xff]   ;;  %v363_v19 = vld [vmem:[#allocation2 + $0x8] sm:$0xff]   ;;  %v364_v20 = vld [vmem:[#allocation2 + $0x18] sm:$0xff]   ;;  %v71_v22 = vshrl.u32 %v70_v21, 7 }
  0x24   :  { %187 = vmatpush1.bf16.msra.mxu0 %v342_v4  ;;  %320 = vmatpush1.bf16.msra.mxu1 %v342_v4  ;;  %v68_v24 = vld [vmem:[%s475_s2] sm:$0x3]  ;;  %s438_s2 = smov [#allocation7]  }
  0x25   :  { %188 = vmatprep.subr.bf16.mxu0 %v343_v5  ;;  %313 = vmatprep.subr.bf16.mxu1 %v343_v5  ;;  %v72_v23 = vsub.s32 0, %v71_v22  ;;  %v76_v25 = vsub.s32 1, %v71_v22  ;;  %s278_s26 = sshll.u32 %s438_s2, 4  ;;  %s279_s26 = int_to_ptr.vmem [resolvable:$true] %s278_s26 }
  0x26   :  { %s405_s27 = scalar_lea.vmem %s279_s26, 2048  ;;  %p410_p11 = scmp.lt.s32.totalorder %s279_s26, %s279_s26 }
  0x27   :  { %v73_v26 = vrot.slane %v68_v24, %v72_v23  ;;  %v77_v27 = vrot.slane %v68_v24, %v76_v25  ;;  %p406_p10 = scmp.ne.s32.totalorder %s279_s26, %s405_s27  ;;  %p411_p12 = scmp.lt.s32.totalorder %s405_s27, %s405_s27 }
  0x28   :  { %189 = vmatpush1.bf16.msra.mxu0 %v345_v6  ;;  %321 = vmatpush1.bf16.msra.mxu1 %v345_v6 }
  0x29   :  { %190 = vmatprep.subr.bf16.mxu0 %v346_v7  ;;  %314 = vmatprep.subr.bf16.mxu1 %v346_v7  ;;  %p412_p13 = por %p411_p12, %p410_p11 }
  0x2b   :  { %p413_p0 = pnand %p412_p13, %p406_p10 }
  0x2c   :  { %191 = vmatpush1.bf16.msra.mxu0 %v348_v8  ;;  %322 = vmatpush1.bf16.msra.mxu1 %v348_v8 }
  0x2d   :  { %192 = vmatprep.subr.bf16.mxu0 %v349_v9  ;;  %315 = vmatprep.subr.bf16.mxu1 %v349_v9 }
  0x30   :  { %193 = vmatpush1.bf16.msra.mxu0 %v351_v10  ;;  %323 = vmatpush1.bf16.msra.mxu1 %v351_v10 }
  0x31   :  { %194 = vmatprep.subr.bf16.mxu0 %v352_v11  ;;  %316 = vmatprep.subr.bf16.mxu1 %v352_v11 }
  0x34   :  { %195 = vmatpush1.bf16.msra.mxu0 %v354_v12  ;;  %324 = vmatpush1.bf16.msra.mxu1 %v354_v12 }
  0x35   :  { %196 = vmatprep.subr.bf16.mxu0 %v355_v13  ;;  %317 = vmatprep.subr.bf16.mxu1 %v355_v13 }
  0x38   :  { %197 = vmatpush1.bf16.msra.mxu0 %v357_v14  ;;  %325 = vmatpush1.bf16.msra.mxu1 %v357_v14 }
  0x39   :  { %198 = vmatprep.subr.bf16.mxu0 %v358_v15  ;;  %318 = vmatprep.subr.bf16.mxu1 %v358_v15 }
  0x3c   :  { %199 = vmatpush1.bf16.msra.mxu0 %v360_v16  ;;  %326 = vmatpush1.bf16.msra.mxu1 %v360_v16 }
  0x3f   :  { %217 = vmatmul.mubr.bf16.vlgmr.msra.gmra.mxu0 %v361_v17  ;;  %237 = vmatmul.mubr.bf16.vlgmr.msra.gmra.mxu1 %v362_v18 }
  0x40   :  { %226 = vmatprep.mubr.bf16.mxu0 %v437_v0  ;;  %246 = vmatprep.mubr.bf16.mxu1 %v437_v0 }
  0x47   :  { %227 = vmatmul.mubr.bf16.gmra.mxu0 %v363_v19  ;;  %247 = vmatmul.mubr.bf16.gmra.mxu1 %v364_v20 }
  0xff   :  { %v218_v28 = vpop.f32.mrf.mxu0  ;;  %v238_v29 = vpop.f32.mrf.mxu1 }
 0x100   :  { %v219_v30 = vadd.f32 %v218_v28, %v73_v26  ;;  %v239_v31 = vadd.f32 %v238_v29, %v73_v26 }
 0x101   :  { %v220_v32 = vpop.f32.mrf.mxu0  ;;  %v240_v33 = vpop.f32.mrf.mxu1 }
 0x102   :  { %257 = vst [vmem:[#allocation7] sm:$0xff] %v219_v30  ;;  %265 = vst [vmem:[#allocation7 + $0x40] sm:$0xff] %v239_v31  ;;  %v221_v34 = vadd.f32 %v220_v32, %v77_v27  ;;  %v241_v35 = vadd.f32 %v240_v33, %v77_v27 }
 0x103   :  { %v222_v36 = vpop.f32.mrf.mxu0  ;;  %v242_v37 = vpop.f32.mrf.mxu1 }
 0x104   :  { %258 = vst [vmem:[#allocation7 + $0x8] sm:$0xff] %v221_v34  ;;  %266 = vst [vmem:[#allocation7 + $0x48] sm:$0xff] %v241_v35  ;;  %v223_v38 = vadd.f32 %v222_v36, %v73_v26  ;;  %v243_v39 = vadd.f32 %v242_v37, %v73_v26 }
 0x105   :  { %v224_v40 = vpop.f32.mrf.mxu0  ;;  %v244_v41 = vpop.f32.mrf.mxu1 }
 0x106   :  { %259 = vst [vmem:[#allocation7 + $0x10] sm:$0xff] %v223_v38  ;;  %267 = vst [vmem:[#allocation7 + $0x50] sm:$0xff] %v243_v39  ;;  %v225_v42 = vadd.f32 %v224_v40, %v77_v27  ;;  %v245_v43 = vadd.f32 %v244_v41, %v77_v27 }
 0x107   :  { %v228_v44 = vpop.f32.mrf.mxu0  ;;  %v248_v45 = vpop.f32.mrf.mxu1 }
 0x108   :  { %260 = vst [vmem:[#allocation7 + $0x18] sm:$0xff] %v225_v42  ;;  %268 = vst [vmem:[#allocation7 + $0x58] sm:$0xff] %v245_v43  ;;  %v229_v46 = vadd.f32 %v228_v44, %v73_v26  ;;  %v249_v47 = vadd.f32 %v248_v45, %v73_v26 }
 0x109   :  { %v230_v48 = vpop.f32.mrf.mxu0  ;;  %v250_v49 = vpop.f32.mrf.mxu1 }
 0x10a   :  { %261 = vst [vmem:[#allocation7 + $0x20] sm:$0xff] %v229_v46  ;;  %269 = vst [vmem:[#allocation7 + $0x60] sm:$0xff] %v249_v47  ;;  %v231_v50 = vadd.f32 %v230_v48, %v77_v27  ;;  %v251_v51 = vadd.f32 %v250_v49, %v77_v27 }
 0x10b   :  { %v232_v52 = vpop.f32.mrf.mxu0  ;;  %v252_v53 = vpop.f32.mrf.mxu1 }
 0x10c   :  { %262 = vst [vmem:[#allocation7 + $0x28] sm:$0xff] %v231_v50  ;;  %270 = vst [vmem:[#allocation7 + $0x68] sm:$0xff] %v251_v51  ;;  %v233_v54 = vadd.f32 %v232_v52, %v73_v26  ;;  %v253_v55 = vadd.f32 %v252_v53, %v73_v26 }
 0x10d   :  { %v234_v56 = vpop.f32.mrf.mxu0  ;;  %v254_v57 = vpop.f32.mrf.mxu1 }
 0x10e   :  { %263 = vst [vmem:[#allocation7 + $0x30] sm:$0xff] %v233_v54  ;;  %271 = vst [vmem:[#allocation7 + $0x70] sm:$0xff] %v253_v55  ;;  %v235_v58 = vadd.f32 %v234_v56, %v77_v27  ;;  %v255_v59 = vadd.f32 %v254_v57, %v77_v27 }
 0x110   :  { %264 = vst [vmem:[#allocation7 + $0x38] sm:$0xff] %v235_v58  ;;  %272 = vst [vmem:[#allocation7 + $0x78] sm:$0xff] %v255_v59 }
 0x111   :  { %416 = shalt.err (!%p413_p0)
}
 0x112   :  { %s439_s28 = smov 256   ;;  %s440_s29 = smov 16  }
 0x113   :  { %284 = dma.vmem_to_hbm [thread:$0]  %s279_s26, 2048, %s476_s3, [#allocation4], %s439_s28, %s439_s28, %s440_s29  }
 0x114   :  { %429 = dma.done.wait [#allocation4], 2048  }
 0x115   :  { %430 = vsyncadd [#allocation4], 4294965248 }
 0x116   :  { %288 = vsyncpa [#allocation3], 1 }
 0x117   :  { %289 = vsyncpa [#allocation6], 1 }
 0x118   :  { %290 = vsyncpa [#allocation4], 1 }

</bundles_post_ra>
